<compile_context>
chip_gen: v7x
topology: tpu7x:2x2x1
jax: 0.10.0
libtpu: 0.0.40
codegen_flags: <defaults>
</compile_context>

<pallas_src>
import functools

import numpy as np
import jax
import jax.numpy as jnp
from jax.experimental import pallas as pl
from jax.experimental.pallas import tpu as pltpu

OUT_PAD = 128  # lane-dense output width (>= 14 logits and >= 2H)


def _gate_perm(H):
    """Column permutation: [i_f f_f g_f o_f | i_b f_b g_b o_b] -> [i_f i_b | f_f f_b | o_f o_b | g_f g_b]."""
    old_gate = [0, 1, 3, 2]  # new blocks (i, f, o, g) -> old per-direction gate index (i,f,g,o)
    perm = np.empty(8 * H, dtype=np.int32)
    for nb, og in enumerate(old_gate):
        for d in range(2):
            perm[nb * 2 * H + d * H:nb * 2 * H + (d + 1) * H] = np.arange(H) + d * 4 * H + og * H
    return perm


def _lstm_head_kernel(tokf_ref,               # (T*B, 1) int32  fwd token (time-major)
                      tokb_ref,               # (T*B, 1) int32  bwd token (time-reversed) + VOCAB
                      wcomb_ref,              # (2V, 8H) bf16   blockdiag(emb@wih_f, emb@wih_b), gate-permuted
                      b_ref,                  # (1, 8H)  f32    fused b_ih+b_hh, both dirs, gate-permuted
                      whh_ref,                # (2H, 8H) bf16   blockdiag(whh_f, whh_b), gate-permuted
                      w12_ref, b12_ref,       # (2H,128) bf16, (1,128) f32  folded ff1@ff (zero-padded)
                      out_ref,                # (B, 128) f32    padded logits
                      hcomb_ref,              # (B, 128) f32    padded h_comb
                      gx_scr,                 # (T*B, 8H) f32   scratch: input pre-gates per step
                      *, batch):
    TB = tokf_ref.shape[0]
    B = batch
    T = TB // B
    H = whh_ref.shape[0] // 2
    GW = 2 * H                                # combined gate width [fwd | bwd]
    V2 = wcomb_ref.shape[0]                   # 2 * vocab

    # ---- prologue: one-hot(fwd tok | bwd tok) @ embedding-folded input weights (one MXU matmul) ----
    lane = jax.lax.broadcasted_iota(jnp.int32, (TB, V2), 1)
    hit = jnp.logical_or(lane == tokf_ref[...], lane == tokb_ref[...])
    oh = jnp.where(hit, 1.0, 0.0).astype(jnp.bfloat16)          # (T*B, 2V) one-hot pair
    gx_scr[...] = (jnp.dot(oh, wcomb_ref[...], preferred_element_type=jnp.float32)
                   + b_ref[...])

    # Hoist the recurrent weight load out of the serial chain (stays resident in vregs).
    whh = whh_ref[...]                        # (2H, 8H) bf16

    h = jnp.zeros((B, 2 * H), jnp.float32)    # [h_fwd | h_bwd]
    c = jnp.zeros((B, 2 * H), jnp.float32)    # [c_fwd | c_bwd]

    # ---- fused, fully-unrolled bidirectional recurrence ----
    # step t: forward consumes time t, backward consumes time T-1-t (already paired in gx_scr row t)
    for t in range(T):
        g = gx_scr[t * B:(t + 1) * B, :] + jnp.dot(
            h.astype(jnp.bfloat16), whh, preferred_element_type=jnp.float32)   # (B, 8H)
        ifo = jax.nn.sigmoid(g[:, :3 * GW])   # contiguous i|f|o block only (6H lanes of EUP work)
        gg = jnp.tanh(g[:, 3 * GW:])          # contiguous g block only (2H lanes)
        i_ = ifo[:, 0 * GW:1 * GW]
        f_ = ifo[:, 1 * GW:2 * GW]
        o_ = ifo[:, 2 * GW:3 * GW]
        c = f_ * c + i_ * gg
        h = o_ * jnp.tanh(c)

    # h == cat([h_n_fwd, h_n_bwd], -1) == h_comb of the reference module.
    out_ref[...] = (jnp.dot(h.astype(jnp.bfloat16), w12_ref[...],
                            preferred_element_type=jnp.float32)
                    + b12_ref[...])                              # lane-dense (B,128) store
    hcomb_ref[...] = jnp.concatenate(
        [h, jnp.zeros((B, hcomb_ref.shape[1] - 2 * H), jnp.float32)], axis=-1)


def prepare_kernel_params(params):
    """Fold / permute / pad / cast parameters once, outside the kernel."""
    H = params["whh_f"].shape[0]
    V = params["emb"].shape[0]
    n_out = params["w2"].shape[1]
    perm = _gate_perm(H)

    # Embedding folded into input projection (exact: padding row 57 of emb is zero).
    w_embih_f = params["emb"] @ params["wih_f"]                  # (V, 4H)
    w_embih_b = params["emb"] @ params["wih_b"]                  # (V, 4H)
    zV = jnp.zeros((V, 4 * H), jnp.float32)
    wcomb = jnp.concatenate(
        [jnp.concatenate([w_embih_f, zV], axis=1),
         jnp.concatenate([zV, w_embih_b], axis=1)], axis=0)      # (2V, 8H) block-diag
    wcomb = wcomb[:, perm].astype(jnp.bfloat16)

    b = jnp.concatenate([params["b_f"], params["b_b"]], axis=1)[:, perm]   # (1, 8H) f32

    zH = jnp.zeros((H, 4 * H), jnp.float32)
    whh = jnp.concatenate(
        [jnp.concatenate([params["whh_f"], zH], axis=1),
         jnp.concatenate([zH, params["whh_b"]], axis=1)], axis=0)          # (2H, 8H) block-diag
    whh = whh[:, perm].astype(jnp.bfloat16)

    # Fold the two head Linears (exact: no nonlinearity between ff1 and ff in the reference).
    w2p = jnp.zeros((H, OUT_PAD), jnp.float32).at[:, :n_out].set(params["w2"])
    b2p = jnp.zeros((1, OUT_PAD), jnp.float32).at[:, :n_out].set(params["b2"])
    w12 = (params["w1"] @ w2p).astype(jnp.bfloat16)              # (2H, 128)
    b12 = params["b1"] @ w2p + b2p                               # (1, 128)

    return dict(wcomb=wcomb, b=b, whh=whh, w12=w12, b12=b12,
                vocab=V, H=H, n_out=n_out)


def custom_lstm_forward(tokens, kp):
    """tokens: (B, T) int32. Returns (logits (B,14), h_comb (B,2H)) like the PyTorch module."""
    B, T = tokens.shape
    V = kp["vocab"]
    H = kp["H"]

    # Tiny int32 glue only: time-major fwd tokens and time-reversed bwd tokens (+V column offset).
    tok_tm = tokens.T                                            # (T, B)
    tok_f = tok_tm.reshape(T * B, 1)
    tok_b = (jnp.flip(tok_tm, axis=0) + V).reshape(T * B, 1)

    vmem = pl.BlockSpec(memory_space=pltpu.MemorySpace.VMEM)
    out_pad, hcomb_pad = pl.pallas_call(
        functools.partial(_lstm_head_kernel, batch=B),
        out_shape=(jax.ShapeDtypeStruct((B, OUT_PAD), jnp.float32),
                   jax.ShapeDtypeStruct((B, OUT_PAD), jnp.float32)),
        in_specs=[vmem] * 7,
        out_specs=(vmem, vmem),
        scratch_shapes=[pltpu.VMEM((T * B, 8 * H), jnp.float32)],
    )(tok_f, tok_b, kp["wcomb"], kp["b"], kp["whh"], kp["w12"], kp["b12"])

    return out_pad[:, :kp["n_out"]], hcomb_pad[:, :2 * H]


def init_params(key, vocab, hidden):
    """Deterministic synthetic parameters, shapes matching the PyTorch module."""
    E, H = vocab, hidden
    ks = jax.random.split(key, 16)

    def u(k, shape, bound):
        return jax.random.uniform(k, shape, jnp.float32, -bound, bound)

    # nn.Embedding(vocab, vocab, padding_idx=57): N(0,1), padding row zeroed.
    emb = jax.random.normal(ks[0], (vocab, E), jnp.float32)
    emb = emb.at[57].set(0.0)

    # LSTM weights: U(-1/sqrt(H), 1/sqrt(H)); stored transposed as (in, 4H), gate order i,f,g,o.
    kb = 1.0 / float(H) ** 0.5
    wih_f = u(ks[1], (E, 4 * H), kb)
    whh_f = u(ks[2], (H, 4 * H), kb)
    b_f = u(ks[3], (1, 4 * H), kb) + u(ks[4], (1, 4 * H), kb)     # b_ih + b_hh fused
    wih_b = u(ks[5], (E, 4 * H), kb)
    whh_b = u(ks[6], (H, 4 * H), kb)
    b_b = u(ks[7], (1, 4 * H), kb) + u(ks[8], (1, 4 * H), kb)

    # ff1: Linear(2H -> H), ff: Linear(H -> 14); stored transposed as (in, out).
    k1 = 1.0 / float(2 * H) ** 0.5
    w1 = u(ks[9], (2 * H, H), k1)
    b1 = u(ks[10], (1, H), k1)
    k2 = 1.0 / float(H) ** 0.5
    w2 = u(ks[11], (H, 14), k2)
    b2 = u(ks[12], (1, 14), k2)

    return dict(emb=emb, wih_f=wih_f, whh_f=whh_f, b_f=b_f,
                wih_b=wih_b, whh_b=whh_b, b_b=b_b,
                w1=w1, b1=b1, w2=w2, b2=b2)


def reference_forward(tokens, params):
    """Pure-JAX f32 reference matching the PyTorch module semantics."""
    x = params["emb"][tokens]                                    # (B, T, E)
    B, T, _ = x.shape
    H = params["whh_f"].shape[0]

    def run_dir(wih, whh, b, xs):
        def step(carry, xt):
            h, c = carry
            g = xt @ wih + h @ whh + b
            i = jax.nn.sigmoid(g[:, 0 * H:1 * H])
            f = jax.nn.sigmoid(g[:, 1 * H:2 * H])
            gg = jnp.tanh(g[:, 2 * H:3 * H])
            o = jax.nn.sigmoid(g[:, 3 * H:4 * H])
            c = f * c + i * gg
            h = o * jnp.tanh(c)
            return (h, c), None

        (h, _), _ = jax.lax.scan(step, (jnp.zeros((B, H)), jnp.zeros((B, H))), xs)
        return h

    xs = jnp.transpose(x, (1, 0, 2))
    h_f = run_dir(params["wih_f"], params["whh_f"], params["b_f"], xs)
    h_b = run_dir(params["wih_b"], params["whh_b"], params["b_b"], xs[::-1])
    h_comb = jnp.concatenate([h_f, h_b], axis=-1)
    out = (h_comb @ params["w1"] + params["b1"]) @ params["w2"] + params["b2"]
    return out, h_comb


if __name__ == "__main__":
    VOCAB = 64    # embedding num_embeddings == embedding_dim == "input" (>= 58 for padding_idx=57)
    HIDDEN = 32
    BATCH = 8
    SEQ = 8

    key = jax.random.PRNGKey(0)
    kp_key, kt_key = jax.random.split(key)
    params = init_params(kp_key, VOCAB, HIDDEN)
    kprep = prepare_kernel_params(params)

    tokens = jax.random.randint(kt_key, (BATCH, SEQ), 0, VOCAB, dtype=jnp.int32)
    tokens = tokens.at[0, -1].set(57)   # exercise the padding_idx row

    fwd = jax.jit(lambda t: custom_lstm_forward(t, kprep))
    logits, h_comb = fwd(tokens)
    jax.block_until_ready((logits, h_comb))

    assert logits.shape == (BATCH, 14) and h_comb.shape == (BATCH, 2 * HIDDEN)
    assert bool(jnp.all(jnp.isfinite(logits))) and bool(jnp.all(jnp.isfinite(h_comb)))

    # Loose-tolerance check vs. f32 reference (bf16 MXU operands introduce small drift).
    ref_logits, ref_h = reference_forward(tokens, params)
    err_l = float(jnp.max(jnp.abs(logits - ref_logits)))
    err_h = float(jnp.max(jnp.abs(h_comb - ref_h)))
    assert err_l < 1e-1 and err_h < 1e-1, (err_l, err_h)

    print("KERNEL_OK")
</pallas_src>

<mosaic_0001>
module attributes {stable_mosaic.version = 11 : i64} {
  func.func @_lstm_head_kernel(%arg0: memref<64x1xi32, #tpu.memory_space<vmem>>, %arg1: memref<64x1xi32, #tpu.memory_space<vmem>>, %arg2: memref<128x256xbf16, #tpu.memory_space<vmem>>, %arg3: memref<1x256xf32, #tpu.memory_space<vmem>>, %arg4: memref<64x256xbf16, #tpu.memory_space<vmem>>, %arg5: memref<64x128xbf16, #tpu.memory_space<vmem>>, %arg6: memref<1x128xf32, #tpu.memory_space<vmem>>, %arg7: memref<8x128xf32, #tpu.memory_space<vmem>>, %arg8: memref<8x128xf32, #tpu.memory_space<vmem>>, %arg9: memref<64x256xf32, #tpu.memory_space<vmem>>) attributes {dimension_semantics = [], scalar_prefetch = 0 : i64, scratch_operands = 1 : i64, tpu.core_type = #tpu.core_type<tc>} {
    %0 = tpu.iota {dimensions = array<i32: 1>} : vector<64x128xi32>
    %c0 = arith.constant 0 : index
    %c0_0 = arith.constant 0 : index
    %1 = vector.load %arg0[%c0, %c0_0] : memref<64x1xi32, #tpu.memory_space<vmem>>, vector<64x1xi32>
    %2 = vector.broadcast %1 : vector<64x1xi32> to vector<64x128xi32>
    %3 = arith.cmpi eq, %0, %2 : vector<64x128xi32>
    %c0_1 = arith.constant 0 : index
    %c0_2 = arith.constant 0 : index
    %4 = vector.load %arg1[%c0_1, %c0_2] : memref<64x1xi32, #tpu.memory_space<vmem>>, vector<64x1xi32>
    %5 = vector.broadcast %4 : vector<64x1xi32> to vector<64x128xi32>
    %6 = arith.cmpi eq, %0, %5 : vector<64x128xi32>
    %7 = arith.ori %3, %6 : vector<64x128xi1>
    %cst = arith.constant 1.000000e+00 : f32
    %cst_3 = arith.constant 0.000000e+00 : f32
    %8 = vector.broadcast %cst : f32 to vector<64x128xf32>
    %9 = vector.broadcast %cst_3 : f32 to vector<64x128xf32>
    %10 = arith.select %7, %8, %9 : vector<64x128xi1>, vector<64x128xf32>
    %11 = arith.truncf %10 : vector<64x128xf32> to vector<64x128xbf16>
    %c0_4 = arith.constant 0 : index
    %c0_5 = arith.constant 0 : index
    %12 = vector.load %arg2[%c0_4, %c0_5] : memref<128x256xbf16, #tpu.memory_space<vmem>>, vector<128x256xbf16>
    %cst_6 = arith.constant dense<0.000000e+00> : vector<64x256xf32>
    %13 = tpu.matmul %11, %12, %cst_6 {dimension_numbers = #tpu.dot_dimension_numbers<[1], [0], [0], [1], [0, 0, 1, 1], [], []>} : vector<64x128xbf16>, vector<128x256xbf16>, vector<64x256xf32> -> vector<64x256xf32>
    %c0_7 = arith.constant 0 : index
    %c0_8 = arith.constant 0 : index
    %14 = vector.load %arg3[%c0_7, %c0_8] : memref<1x256xf32, #tpu.memory_space<vmem>>, vector<1x256xf32>
    %15 = vector.broadcast %14 : vector<1x256xf32> to vector<64x256xf32>
    %16 = arith.addf %13, %15 : vector<64x256xf32>
    %c0_9 = arith.constant 0 : index
    %c0_10 = arith.constant 0 : index
    %17 = vector.load %arg9[%c0_9, %c0_10] : memref<64x256xf32, #tpu.memory_space<vmem>>, vector<64x256xf32>
    tpu.vector_store %arg9[%c0_9, %c0_10], %16 {strides = array<i32>} : memref<64x256xf32, #tpu.memory_space<vmem>>, vector<64x256xf32>,
    %c0_11 = arith.constant 0 : index
    %c0_12 = arith.constant 0 : index
    %18 = vector.load %arg4[%c0_11, %c0_12] : memref<64x256xbf16, #tpu.memory_space<vmem>>, vector<64x256xbf16>
    %cst_13 = arith.constant 0.000000e+00 : f32
    %19 = vector.broadcast %cst_13 : f32 to vector<8x64xf32>
    %cst_14 = arith.constant 0.000000e+00 : f32
    %20 = vector.broadcast %cst_14 : f32 to vector<8x64xf32>
    %c0_15 = arith.constant 0 : index
    %c0_16 = arith.constant 0 : index
    %21 = vector.load %arg9[%c0_15, %c0_16] : memref<64x256xf32, #tpu.memory_space<vmem>>, vector<8x256xf32>
    %22 = arith.truncf %19 : vector<8x64xf32> to vector<8x64xbf16>
    %cst_17 = arith.constant dense<0.000000e+00> : vector<8x256xf32>
    %23 = tpu.matmul %22, %18, %cst_17 {dimension_numbers = #tpu.dot_dimension_numbers<[1], [0], [0], [1], [0, 0, 1, 1], [], []>} : vector<8x64xbf16>, vector<64x256xbf16>, vector<8x256xf32> -> vector<8x256xf32>
    %24 = arith.addf %21, %23 : vector<8x256xf32>
    %25 = vector.extract_strided_slice %24 {offsets = [0, 0], sizes = [8, 192], strides = [1, 1]} : vector<8x256xf32> to vector<8x192xf32>
    %26 = arith.negf %25 : vector<8x192xf32>
    %27 = math.exp %26 : vector<8x192xf32>
    %cst_18 = arith.constant 1.000000e+00 : f32
    %28 = vector.broadcast %cst_18 : f32 to vector<8x192xf32>
    %29 = arith.addf %28, %27 : vector<8x192xf32>
    %30 = arith.divf %28, %29 : vector<8x192xf32>
    %31 = vector.extract_strided_slice %24 {offsets = [0, 192], sizes = [8, 64], strides = [1, 1]} : vector<8x256xf32> to vector<8x64xf32>
    %32 = math.tanh %31 : vector<8x64xf32>
    %33 = vector.extract_strided_slice %30 {offsets = [0, 0], sizes = [8, 64], strides = [1, 1]} : vector<8x192xf32> to vector<8x64xf32>
    %34 = vector.extract_strided_slice %30 {offsets = [0, 64], sizes = [8, 64], strides = [1, 1]} : vector<8x192xf32> to vector<8x64xf32>
    %35 = vector.extract_strided_slice %30 {offsets = [0, 128], sizes = [8, 64], strides = [1, 1]} : vector<8x192xf32> to vector<8x64xf32>
    %36 = arith.mulf %34, %20 : vector<8x64xf32>
    %37 = arith.mulf %33, %32 : vector<8x64xf32>
    %38 = arith.addf %36, %37 : vector<8x64xf32>
    %39 = math.tanh %38 : vector<8x64xf32>
    %40 = arith.mulf %35, %39 : vector<8x64xf32>
    %c8 = arith.constant 8 : index
    %c0_19 = arith.constant 0 : index
    %41 = vector.load %arg9[%c8, %c0_19] : memref<64x256xf32, #tpu.memory_space<vmem>>, vector<8x256xf32>
    %42 = arith.truncf %40 : vector<8x64xf32> to vector<8x64xbf16>
    %cst_20 = arith.constant dense<0.000000e+00> : vector<8x256xf32>
    %43 = tpu.matmul %42, %18, %cst_20 {dimension_numbers = #tpu.dot_dimension_numbers<[1], [0], [0], [1], [0, 0, 1, 1], [], []>} : vector<8x64xbf16>, vector<64x256xbf16>, vector<8x256xf32> -> vector<8x256xf32>
    %44 = arith.addf %41, %43 : vector<8x256xf32>
    %45 = vector.extract_strided_slice %44 {offsets = [0, 0], sizes = [8, 192], strides = [1, 1]} : vector<8x256xf32> to vector<8x192xf32>
    %46 = arith.negf %45 : vector<8x192xf32>
    %47 = math.exp %46 : vector<8x192xf32>
    %cst_21 = arith.constant 1.000000e+00 : f32
    %48 = vector.broadcast %cst_21 : f32 to vector<8x192xf32>
    %49 = arith.addf %48, %47 : vector<8x192xf32>
    %50 = arith.divf %48, %49 : vector<8x192xf32>
    %51 = vector.extract_strided_slice %44 {offsets = [0, 192], sizes = [8, 64], strides = [1, 1]} : vector<8x256xf32> to vector<8x64xf32>
    %52 = math.tanh %51 : vector<8x64xf32>
    %53 = vector.extract_strided_slice %50 {offsets = [0, 0], sizes = [8, 64], strides = [1, 1]} : vector<8x192xf32> to vector<8x64xf32>
    %54 = vector.extract_strided_slice %50 {offsets = [0, 64], sizes = [8, 64], strides = [1, 1]} : vector<8x192xf32> to vector<8x64xf32>
    %55 = vector.extract_strided_slice %50 {offsets = [0, 128], sizes = [8, 64], strides = [1, 1]} : vector<8x192xf32> to vector<8x64xf32>
    %56 = arith.mulf %54, %38 : vector<8x64xf32>
    %57 = arith.mulf %53, %52 : vector<8x64xf32>
    %58 = arith.addf %56, %57 : vector<8x64xf32>
    %59 = math.tanh %58 : vector<8x64xf32>
    %60 = arith.mulf %55, %59 : vector<8x64xf32>
    %c16 = arith.constant 16 : index
    %c0_22 = arith.constant 0 : index
    %61 = vector.load %arg9[%c16, %c0_22] : memref<64x256xf32, #tpu.memory_space<vmem>>, vector<8x256xf32>
    %62 = arith.truncf %60 : vector<8x64xf32> to vector<8x64xbf16>
    %cst_23 = arith.constant dense<0.000000e+00> : vector<8x256xf32>
    %63 = tpu.matmul %62, %18, %cst_23 {dimension_numbers = #tpu.dot_dimension_numbers<[1], [0], [0], [1], [0, 0, 1, 1], [], []>} : vector<8x64xbf16>, vector<64x256xbf16>, vector<8x256xf32> -> vector<8x256xf32>
    %64 = arith.addf %61, %63 : vector<8x256xf32>
    %65 = vector.extract_strided_slice %64 {offsets = [0, 0], sizes = [8, 192], strides = [1, 1]} : vector<8x256xf32> to vector<8x192xf32>
    %66 = arith.negf %65 : vector<8x192xf32>
    %67 = math.exp %66 : vector<8x192xf32>
    %cst_24 = arith.constant 1.000000e+00 : f32
    %68 = vector.broadcast %cst_24 : f32 to vector<8x192xf32>
    %69 = arith.addf %68, %67 : vector<8x192xf32>
    %70 = arith.divf %68, %69 : vector<8x192xf32>
    %71 = vector.extract_strided_slice %64 {offsets = [0, 192], sizes = [8, 64], strides = [1, 1]} : vector<8x256xf32> to vector<8x64xf32>
    %72 = math.tanh %71 : vector<8x64xf32>
    %73 = vector.extract_strided_slice %70 {offsets = [0, 0], sizes = [8, 64], strides = [1, 1]} : vector<8x192xf32> to vector<8x64xf32>
    %74 = vector.extract_strided_slice %70 {offsets = [0, 64], sizes = [8, 64], strides = [1, 1]} : vector<8x192xf32> to vector<8x64xf32>
    %75 = vector.extract_strided_slice %70 {offsets = [0, 128], sizes = [8, 64], strides = [1, 1]} : vector<8x192xf32> to vector<8x64xf32>
    %76 = arith.mulf %74, %58 : vector<8x64xf32>
    %77 = arith.mulf %73, %72 : vector<8x64xf32>
    %78 = arith.addf %76, %77 : vector<8x64xf32>
    %79 = math.tanh %78 : vector<8x64xf32>
    %80 = arith.mulf %75, %79 : vector<8x64xf32>
    %c24 = arith.constant 24 : index
    %c0_25 = arith.constant 0 : index
    %81 = vector.load %arg9[%c24, %c0_25] : memref<64x256xf32, #tpu.memory_space<vmem>>, vector<8x256xf32>
    %82 = arith.truncf %80 : vector<8x64xf32> to vector<8x64xbf16>
    %cst_26 = arith.constant dense<0.000000e+00> : vector<8x256xf32>
    %83 = tpu.matmul %82, %18, %cst_26 {dimension_numbers = #tpu.dot_dimension_numbers<[1], [0], [0], [1], [0, 0, 1, 1], [], []>} : vector<8x64xbf16>, vector<64x256xbf16>, vector<8x256xf32> -> vector<8x256xf32>
    %84 = arith.addf %81, %83 : vector<8x256xf32>
    %85 = vector.extract_strided_slice %84 {offsets = [0, 0], sizes = [8, 192], strides = [1, 1]} : vector<8x256xf32> to vector<8x192xf32>
    %86 = arith.negf %85 : vector<8x192xf32>
    %87 = math.exp %86 : vector<8x192xf32>
    %cst_27 = arith.constant 1.000000e+00 : f32
    %88 = vector.broadcast %cst_27 : f32 to vector<8x192xf32>
    %89 = arith.addf %88, %87 : vector<8x192xf32>
    %90 = arith.divf %88, %89 : vector<8x192xf32>
    %91 = vector.extract_strided_slice %84 {offsets = [0, 192], sizes = [8, 64], strides = [1, 1]} : vector<8x256xf32> to vector<8x64xf32>
    %92 = math.tanh %91 : vector<8x64xf32>
    %93 = vector.extract_strided_slice %90 {offsets = [0, 0], sizes = [8, 64], strides = [1, 1]} : vector<8x192xf32> to vector<8x64xf32>
    %94 = vector.extract_strided_slice %90 {offsets = [0, 64], sizes = [8, 64], strides = [1, 1]} : vector<8x192xf32> to vector<8x64xf32>
    %95 = vector.extract_strided_slice %90 {offsets = [0, 128], sizes = [8, 64], strides = [1, 1]} : vector<8x192xf32> to vector<8x64xf32>
    %96 = arith.mulf %94, %78 : vector<8x64xf32>
    %97 = arith.mulf %93, %92 : vector<8x64xf32>
    %98 = arith.addf %96, %97 : vector<8x64xf32>
    %99 = math.tanh %98 : vector<8x64xf32>
    %100 = arith.mulf %95, %99 : vector<8x64xf32>
    %c32 = arith.constant 32 : index
    %c0_28 = arith.constant 0 : index
    %101 = vector.load %arg9[%c32, %c0_28] : memref<64x256xf32, #tpu.memory_space<vmem>>, vector<8x256xf32>
    %102 = arith.truncf %100 : vector<8x64xf32> to vector<8x64xbf16>
    %cst_29 = arith.constant dense<0.000000e+00> : vector<8x256xf32>
    %103 = tpu.matmul %102, %18, %cst_29 {dimension_numbers = #tpu.dot_dimension_numbers<[1], [0], [0], [1], [0, 0, 1, 1], [], []>} : vector<8x64xbf16>, vector<64x256xbf16>, vector<8x256xf32> -> vector<8x256xf32>
    %104 = arith.addf %101, %103 : vector<8x256xf32>
    %105 = vector.extract_strided_slice %104 {offsets = [0, 0], sizes = [8, 192], strides = [1, 1]} : vector<8x256xf32> to vector<8x192xf32>
    %106 = arith.negf %105 : vector<8x192xf32>
    %107 = math.exp %106 : vector<8x192xf32>
    %cst_30 = arith.constant 1.000000e+00 : f32
    %108 = vector.broadcast %cst_30 : f32 to vector<8x192xf32>
    %109 = arith.addf %108, %107 : vector<8x192xf32>
    %110 = arith.divf %108, %109 : vector<8x192xf32>
    %111 = vector.extract_strided_slice %104 {offsets = [0, 192], sizes = [8, 64], strides = [1, 1]} : vector<8x256xf32> to vector<8x64xf32>
    %112 = math.tanh %111 : vector<8x64xf32>
    %113 = vector.extract_strided_slice %110 {offsets = [0, 0], sizes = [8, 64], strides = [1, 1]} : vector<8x192xf32> to vector<8x64xf32>
    %114 = vector.extract_strided_slice %110 {offsets = [0, 64], sizes = [8, 64], strides = [1, 1]} : vector<8x192xf32> to vector<8x64xf32>
    %115 = vector.extract_strided_slice %110 {offsets = [0, 128], sizes = [8, 64], strides = [1, 1]} : vector<8x192xf32> to vector<8x64xf32>
    %116 = arith.mulf %114, %98 : vector<8x64xf32>
    %117 = arith.mulf %113, %112 : vector<8x64xf32>
    %118 = arith.addf %116, %117 : vector<8x64xf32>
    %119 = math.tanh %118 : vector<8x64xf32>
    %120 = arith.mulf %115, %119 : vector<8x64xf32>
    %c40 = arith.constant 40 : index
    %c0_31 = arith.constant 0 : index
    %121 = vector.load %arg9[%c40, %c0_31] : memref<64x256xf32, #tpu.memory_space<vmem>>, vector<8x256xf32>
    %122 = arith.truncf %120 : vector<8x64xf32> to vector<8x64xbf16>
    %cst_32 = arith.constant dense<0.000000e+00> : vector<8x256xf32>
    %123 = tpu.matmul %122, %18, %cst_32 {dimension_numbers = #tpu.dot_dimension_numbers<[1], [0], [0], [1], [0, 0, 1, 1], [], []>} : vector<8x64xbf16>, vector<64x256xbf16>, vector<8x256xf32> -> vector<8x256xf32>
    %124 = arith.addf %121, %123 : vector<8x256xf32>
    %125 = vector.extract_strided_slice %124 {offsets = [0, 0], sizes = [8, 192], strides = [1, 1]} : vector<8x256xf32> to vector<8x192xf32>
    %126 = arith.negf %125 : vector<8x192xf32>
    %127 = math.exp %126 : vector<8x192xf32>
    %cst_33 = arith.constant 1.000000e+00 : f32
    %128 = vector.broadcast %cst_33 : f32 to vector<8x192xf32>
    %129 = arith.addf %128, %127 : vector<8x192xf32>
    %130 = arith.divf %128, %129 : vector<8x192xf32>
    %131 = vector.extract_strided_slice %124 {offsets = [0, 192], sizes = [8, 64], strides = [1, 1]} : vector<8x256xf32> to vector<8x64xf32>
    %132 = math.tanh %131 : vector<8x64xf32>
    %133 = vector.extract_strided_slice %130 {offsets = [0, 0], sizes = [8, 64], strides = [1, 1]} : vector<8x192xf32> to vector<8x64xf32>
    %134 = vector.extract_strided_slice %130 {offsets = [0, 64], sizes = [8, 64], strides = [1, 1]} : vector<8x192xf32> to vector<8x64xf32>
    %135 = vector.extract_strided_slice %130 {offsets = [0, 128], sizes = [8, 64], strides = [1, 1]} : vector<8x192xf32> to vector<8x64xf32>
    %136 = arith.mulf %134, %118 : vector<8x64xf32>
    %137 = arith.mulf %133, %132 : vector<8x64xf32>
    %138 = arith.addf %136, %137 : vector<8x64xf32>
    %139 = math.tanh %138 : vector<8x64xf32>
    %140 = arith.mulf %135, %139 : vector<8x64xf32>
    %c48 = arith.constant 48 : index
    %c0_34 = arith.constant 0 : index
    %141 = vector.load %arg9[%c48, %c0_34] : memref<64x256xf32, #tpu.memory_space<vmem>>, vector<8x256xf32>
    %142 = arith.truncf %140 : vector<8x64xf32> to vector<8x64xbf16>
    %cst_35 = arith.constant dense<0.000000e+00> : vector<8x256xf32>
    %143 = tpu.matmul %142, %18, %cst_35 {dimension_numbers = #tpu.dot_dimension_numbers<[1], [0], [0], [1], [0, 0, 1, 1], [], []>} : vector<8x64xbf16>, vector<64x256xbf16>, vector<8x256xf32> -> vector<8x256xf32>
    %144 = arith.addf %141, %143 : vector<8x256xf32>
    %145 = vector.extract_strided_slice %144 {offsets = [0, 0], sizes = [8, 192], strides = [1, 1]} : vector<8x256xf32> to vector<8x192xf32>
    %146 = arith.negf %145 : vector<8x192xf32>
    %147 = math.exp %146 : vector<8x192xf32>
    %cst_36 = arith.constant 1.000000e+00 : f32
    %148 = vector.broadcast %cst_36 : f32 to vector<8x192xf32>
    %149 = arith.addf %148, %147 : vector<8x192xf32>
    %150 = arith.divf %148, %149 : vector<8x192xf32>
    %151 = vector.extract_strided_slice %144 {offsets = [0, 192], sizes = [8, 64], strides = [1, 1]} : vector<8x256xf32> to vector<8x64xf32>
    %152 = math.tanh %151 : vector<8x64xf32>
    %153 = vector.extract_strided_slice %150 {offsets = [0, 0], sizes = [8, 64], strides = [1, 1]} : vector<8x192xf32> to vector<8x64xf32>
    %154 = vector.extract_strided_slice %150 {offsets = [0, 64], sizes = [8, 64], strides = [1, 1]} : vector<8x192xf32> to vector<8x64xf32>
    %155 = vector.extract_strided_slice %150 {offsets = [0, 128], sizes = [8, 64], strides = [1, 1]} : vector<8x192xf32> to vector<8x64xf32>
    %156 = arith.mulf %154, %138 : vector<8x64xf32>
    %157 = arith.mulf %153, %152 : vector<8x64xf32>
    %158 = arith.addf %156, %157 : vector<8x64xf32>
    %159 = math.tanh %158 : vector<8x64xf32>
    %160 = arith.mulf %155, %159 : vector<8x64xf32>
    %c56 = arith.constant 56 : index
    %c0_37 = arith.constant 0 : index
    %161 = vector.load %arg9[%c56, %c0_37] : memref<64x256xf32, #tpu.memory_space<vmem>>, vector<8x256xf32>
    %162 = arith.truncf %160 : vector<8x64xf32> to vector<8x64xbf16>
    %cst_38 = arith.constant dense<0.000000e+00> : vector<8x256xf32>
    %163 = tpu.matmul %162, %18, %cst_38 {dimension_numbers = #tpu.dot_dimension_numbers<[1], [0], [0], [1], [0, 0, 1, 1], [], []>} : vector<8x64xbf16>, vector<64x256xbf16>, vector<8x256xf32> -> vector<8x256xf32>
    %164 = arith.addf %161, %163 : vector<8x256xf32>
    %165 = vector.extract_strided_slice %164 {offsets = [0, 0], sizes = [8, 192], strides = [1, 1]} : vector<8x256xf32> to vector<8x192xf32>
    %166 = arith.negf %165 : vector<8x192xf32>
    %167 = math.exp %166 : vector<8x192xf32>
    %cst_39 = arith.constant 1.000000e+00 : f32
    %168 = vector.broadcast %cst_39 : f32 to vector<8x192xf32>
    %169 = arith.addf %168, %167 : vector<8x192xf32>
    %170 = arith.divf %168, %169 : vector<8x192xf32>
    %171 = vector.extract_strided_slice %164 {offsets = [0, 192], sizes = [8, 64], strides = [1, 1]} : vector<8x256xf32> to vector<8x64xf32>
    %172 = math.tanh %171 : vector<8x64xf32>
    %173 = vector.extract_strided_slice %170 {offsets = [0, 0], sizes = [8, 64], strides = [1, 1]} : vector<8x192xf32> to vector<8x64xf32>
    %174 = vector.extract_strided_slice %170 {offsets = [0, 64], sizes = [8, 64], strides = [1, 1]} : vector<8x192xf32> to vector<8x64xf32>
    %175 = vector.extract_strided_slice %170 {offsets = [0, 128], sizes = [8, 64], strides = [1, 1]} : vector<8x192xf32> to vector<8x64xf32>
    %176 = arith.mulf %174, %158 : vector<8x64xf32>
    %177 = arith.mulf %173, %172 : vector<8x64xf32>
    %178 = arith.addf %176, %177 : vector<8x64xf32>
    %179 = math.tanh %178 : vector<8x64xf32>
    %180 = arith.mulf %175, %179 : vector<8x64xf32>
    %181 = arith.truncf %180 : vector<8x64xf32> to vector<8x64xbf16>
    %c0_40 = arith.constant 0 : index
    %c0_41 = arith.constant 0 : index
    %182 = vector.load %arg5[%c0_40, %c0_41] : memref<64x128xbf16, #tpu.memory_space<vmem>>, vector<64x128xbf16>
    %cst_42 = arith.constant dense<0.000000e+00> : vector<8x128xf32>
    %183 = tpu.matmul %181, %182, %cst_42 {dimension_numbers = #tpu.dot_dimension_numbers<[1], [0], [0], [1], [0, 0, 1, 1], [], []>} : vector<8x64xbf16>, vector<64x128xbf16>, vector<8x128xf32> -> vector<8x128xf32>
    %c0_43 = arith.constant 0 : index
    %c0_44 = arith.constant 0 : index
    %184 = vector.load %arg6[%c0_43, %c0_44] : memref<1x128xf32, #tpu.memory_space<vmem>>, vector<1x128xf32>
    %185 = vector.broadcast %184 : vector<1x128xf32> to vector<8x128xf32>
    %186 = arith.addf %183, %185 : vector<8x128xf32>
    %c0_45 = arith.constant 0 : index
    %c0_46 = arith.constant 0 : index
    %187 = vector.load %arg7[%c0_45, %c0_46] : memref<8x128xf32, #tpu.memory_space<vmem>>, vector<8x128xf32>
    tpu.vector_store %arg7[%c0_45, %c0_46], %186 {strides = array<i32>} : memref<8x128xf32, #tpu.memory_space<vmem>>, vector<8x128xf32>,
    %cst_47 = arith.constant 0.000000e+00 : f32
    %188 = vector.broadcast %cst_47 : f32 to vector<8x64xf32>
    %189 = tpu.concatenate %180, %188 in 1 : vector<8x64xf32>, vector<8x64xf32> -> vector<8x128xf32>
    %c0_48 = arith.constant 0 : index
    %c0_49 = arith.constant 0 : index
    %190 = vector.load %arg8[%c0_48, %c0_49] : memref<8x128xf32, #tpu.memory_space<vmem>>, vector<8x128xf32>
    tpu.vector_store %arg8[%c0_48, %c0_49], %189 {strides = array<i32>} : memref<8x128xf32, #tpu.memory_space<vmem>>, vector<8x128xf32>,
    return
  }
}

</mosaic_0001>

<bundles_post_ra>
// kernel: _lambda_.1
= control target key start
LH: loop header
LB: loop body
LE: loop exit
PB: predicated region body
PF: predicated region fallthrough
CT: control target
= control target key end

     0   :  { %14 = vsyncpa [#allocation4], 0  ;;  %v1395_v2 = vmov 0   ;;  %s1811_s0 = inlined_call_operand.vmem [shape: s32[64,1], index: 0, kind: input, shape index: {}]   ;;  %s1812_s1 = inlined_call_operand.vmem [shape: s32[64,1], index: 1, kind: input, shape index: {}]   ;;  %s1813_s2 = inlined_call_operand.vmem [shape: bf16[128,256], index: 2, kind: input, shape index: {}]   ;;  %s1814_s3 = inlined_call_operand.vmem [shape: f32[1,256], index: 3, kind: input, shape index: {}]   ;;  %s1815_s4 = inlined_call_operand.vmem [shape: bf16[64,256], index: 4, kind: input, shape index: {}]   ;;  %s1816_s5 = inlined_call_operand.vmem [shape: bf16[64,128], index: 5, kind: input, shape index: {}]   ;;  %s1817_s6 = inlined_call_operand.vmem [shape: f32[1,128], index: 6, kind: input, shape index: {}]   ;;  %s1818_s7 = inlined_call_operand.hbm [shape: f32[8,128], index: 7, kind: output, shape index: {0}]   ;;  %s1819_s8 = inlined_call_operand.hbm [shape: f32[8,128], index: 8, kind: output, shape index: {1}]  }
   0x1   :  { %v73_v0 = vld [vmem:[%s1812_s1] sm:$0xff]  ;;  %1210 = vset.pattern.permute.xlu1 %v1395_v2  ;;  %1209 = vset.pattern.permute.xlu0 %v1395_v2  ;;  %v74_v3 = vld [vmem:[%s1812_s1 + $0x8] sm:$0xff]  ;;  %v1214_v7 = vld [vmem:[%s1813_s2 + $0x14] ss:$8 sps:$4 sm:$0xff]  }
   0x2   :  { %v33_v1 = vld [vmem:[%s1811_s0] sm:$0xff]  ;;  %82 = vperm.xlu1 %1210, %v73_v0   ;;  %v34_v6 = vld [vmem:[%s1811_s0 + $0x8] sm:$0xff]  ;;  %416 = vmatprep.mubr.bf16.mxu1 %v1395_v2  ;;  %v1216_v8 = vld [vmem:[%s1813_s2 + $0x10] ss:$8 sps:$4 sm:$0xff]  }
   0x3   :  { %42 = vperm.xlu0 %1209, %v33_v1   ;;  %v1211_v4 = vld [vmem:[%s1813_s2 + $0x4] ss:$8 sps:$4 sm:$0xff]   ;;  %v1213_v5 = vld [vmem:[%s1813_s2] ss:$8 sps:$4 sm:$0xff]   ;;  %273 = vmatprep.mubr.bf16.mxu0 %v1395_v2  ;;  %v1220_v13 = vld [vmem:[%s1813_s2 + $0x34] ss:$8 sps:$4 sm:$0xff]  }
   0x4   :  { %241 = vmatprep.subr.bf16.mxu0 %v1211_v4  ;;  %v1217_v9 = vld [vmem:[%s1813_s2 + $0x24] ss:$8 sps:$4 sm:$0xff]   ;;  %v1219_v11 = vld [vmem:[%s1813_s2 + $0x20] ss:$8 sps:$4 sm:$0xff]   ;;  %v1499_v14 = vld [vmem:[%s1815_s4 + $0x14] ss:$8 sps:$4 sm:$0xff]  }
   0x5   :  { %242 = vmatpush1.bf16.msra.mxu0 %v1213_v5  ;;  %v1481_v10 = vld [vmem:[%s1815_s4 + $0x4] ss:$8 sps:$4 sm:$0xff]   ;;  %v1489_v12 = vld [vmem:[%s1815_s4] ss:$8 sps:$4 sm:$0xff]   ;;  %v1504_v15 = vld [vmem:[%s1815_s4 + $0x10] ss:$8 sps:$4 sm:$0xff]  }
   0x6   :  { %85 = vperm.xlu1 %1210, %v74_v3   ;;  %243 = vmatprep.subr.bf16.mxu0 %v1214_v7  ;;  %v1510_v16 = vld [vmem:[%s1815_s4 + $0x24] ss:$8 sps:$4 sm:$0xff]   ;;  %v1222_v17 = vld [vmem:[%s1813_s2 + $0x30] ss:$8 sps:$4 sm:$0xff]   ;;  %v1522_v19 = vld [vmem:[%s1815_s4 + $0x20] ss:$8 sps:$4 sm:$0xff]  }
   0x7   :  { %45 = vperm.xlu0 %1209, %v34_v6   ;;  %384 = vmatprep.subr.bf16.mxu1 %v1481_v10  ;;  %v1225_v18 = vld [vmem:[%s1813_s2 + $0x44] ss:$8 sps:$4 sm:$0xff]   ;;  %v1528_v20 = vld [vmem:[%s1815_s4 + $0x34] ss:$8 sps:$4 sm:$0xff]   ;;  %v1228_v21 = vld [vmem:[%s1813_s2 + $0x40] ss:$8 sps:$4 sm:$0xff]  }
   0x8   :  { %385 = vmatpush1.bf16.msra.mxu1 %v1489_v12  ;;  %v1231_v22 = vld [vmem:[%s1813_s2 + $0x54] ss:$8 sps:$4 sm:$0xff]   ;;  %v1539_v23 = vld [vmem:[%s1815_s4 + $0x30] ss:$8 sps:$4 sm:$0xff]  }
   0x9   :  { %244 = vmatpush1.bf16.msra.mxu0 %v1216_v8  ;;  %386 = vmatprep.subr.bf16.mxu1 %v1499_v14 }
   0xa   :  { %245 = vmatprep.subr.bf16.mxu0 %v1217_v9 }
   0xc   :  { %387 = vmatpush1.bf16.msra.mxu1 %v1504_v15 }
   0xd   :  { %246 = vmatpush1.bf16.msra.mxu0 %v1219_v11  ;;  %388 = vmatprep.subr.bf16.mxu1 %v1510_v16 }
   0xe   :  { %247 = vmatprep.subr.bf16.mxu0 %v1220_v13 }
  0x10   :  { %389 = vmatpush1.bf16.msra.mxu1 %v1522_v19 }
  0x11   :  { %248 = vmatpush1.bf16.msra.mxu0 %v1222_v17  ;;  %390 = vmatprep.subr.bf16.mxu1 %v1528_v20 }
  0x12   :  { %249 = vmatprep.subr.bf16.mxu0 %v1225_v18 }
  0x13   :  { %15 = vsyncpa [#allocation6], 0  ;;  %v1234_v24 = vld [vmem:[%s1813_s2 + $0x50] ss:$8 sps:$4 sm:$0xff]   ;;  %v1237_v25 = vld [vmem:[%s1813_s2 + $0x64] ss:$8 sps:$4 sm:$0xff]   ;;  %v31_v29 = vlaneseq }
  0x14   :  { %391 = vmatpush1.bf16.msra.mxu1 %v1539_v23  ;;  %v1240_v26 = vld [vmem:[%s1813_s2 + $0x60] ss:$8 sps:$4 sm:$0xff]   ;;  %v1243_v27 = vld [vmem:[%s1813_s2 + $0x74] ss:$8 sps:$4 sm:$0xff]   ;;  %v1246_v28 = vld [vmem:[%s1813_s2 + $0x70] ss:$8 sps:$4 sm:$0xff]  }
  0x15   :  { %250 = vmatpush1.bf16.msra.mxu0 %v1228_v21  ;;  %463 = vmatprep.subr.bf16.mxu1 %v1481_v10  ;;  %v1571_v30 = vand.u32 127, %v31_v29  ;;  %v1396_v35 = vmov 1.0|1.0   ;;  %v152_v40 = vshrl.u32 %v31_v29, 7  ;;  %v149_v42 = vld [vmem:[%s1814_s3] sm:$0x3] }
  0x16   :  { %251 = vmatprep.subr.bf16.mxu0 %v1231_v22  ;;  %s1397_s17 = smov 64   ;;  %vm380_vm7 = vcmask 523264  }
  0x17   :  { %417 = vmatmul.mubr.bf16.vlgmr.msra.gmra.mrb[0].mxu1 %v1395_v2  ;;  %v153_v41 = vsub.s32 0, %v152_v40  ;;  %v157_v43 = vsub.s32 1, %v152_v40 }
  0x18   :  { %464 = vmatpush1.bf16.msra.mxu1 %v1489_v12  ;;  %495 = vmatprep.mubr.bf16.mxu1 %v1395_v2 }
  0x19   :  { %252 = vmatpush1.bf16.msra.mxu0 %v1234_v24  ;;  %465 = vmatprep.subr.bf16.mxu1 %v1499_v14  ;;  %v1590_v44 = vrot.slane %v149_v42, %v153_v41  ;;  %v1592_v45 = vrot.slane %v149_v42, %v157_v43 }
  0x1a   :  { %253 = vmatprep.subr.bf16.mxu0 %v1237_v25 }
  0x1c   :  { %466 = vmatpush1.bf16.msra.mxu1 %v1504_v15 }
  0x1d   :  { %254 = vmatpush1.bf16.msra.mxu0 %v1240_v26  ;;  %467 = vmatprep.subr.bf16.mxu1 %v1510_v16  ;;  %v35_v26 = vld [vmem:[%s1811_s0 + $0x10] sm:$0xff] }
  0x1e   :  { %255 = vmatprep.subr.bf16.mxu0 %v1243_v27  ;;  %v75_v27 = vld [vmem:[%s1812_s1 + $0x10] sm:$0xff] }
  0x20   :  { %468 = vmatpush1.bf16.msra.mxu1 %v1522_v19 }
  0x21   :  { %256 = vmatpush1.bf16.msra.mxu0 %v1246_v28  ;;  %469 = vmatprep.subr.bf16.mxu1 %v1528_v20 }
  0x22   :  { %621 = vmatprep.subr.bf16.mxu0 %v1481_v10 }
  0x24   :  { %470 = vmatpush1.bf16.msra.mxu1 %v1539_v23 }
  0x25   :  { %542 = vmatprep.subr.bf16.mxu1 %v1481_v10 }
  0x81   :  { %v83_v31 = vpop.permute.xlu1 %82 }
  0x82   :  { %v43_v32 = vpop.permute.xlu0 %42  ;;  %vm105_vm0 = vcmp.eq.s32.totalorder %v1571_v30, %v83_v31 }
  0x83   :  { %vm65_vm1 = vcmp.eq.s32.totalorder %v1571_v30, %v43_v32 }
  0x84   :  { %vm113_vm2 = vmor %vm65_vm1, %vm105_vm0 }
  0x85   :  { %v86_v33 = vpop.permute.xlu1 %85 }
  0x86   :  { %v46_v34 = vpop.permute.xlu0 %45  ;;  %vm106_vm3 = vcmp.eq.s32.totalorder %v1571_v30, %v86_v33 }
  0x87   :  { %vm66_vm4 = vcmp.eq.s32.totalorder %v1571_v30, %v46_v34 }
  0x88   :  { %vm114_vm5 = vmor %vm66_vm4, %vm106_vm3 }
  0x89   :  { %vm1140_vm6 = vmpackc.low %vm114_vm5, %vm113_vm2 }
  0x8a   :  { %1141 = vmatmul.mubr.msk.bf16.vlgmr.msra.gmra.mrb[0].mxu0 %vm1140_vm6, %v1396_v35 }
  0x8b   :  { %283 = vmatprep.mubr.bf16.mxu0 %v1395_v2  ;;  %622 = vmatpush1.bf16.msra.mxu0 %v1489_v12 }
  0x8c   :  { %623 = vmatprep.subr.bf16.mxu0 %v1499_v14 }
  0x8f   :  { %624 = vmatpush1.bf16.msra.mxu0 %v1504_v15 }
  0x90   :  { %625 = vmatprep.subr.bf16.mxu0 %v1510_v16 }
  0x93   :  { %626 = vmatpush1.bf16.msra.mxu0 %v1522_v19 }
  0x94   :  { %627 = vmatprep.subr.bf16.mxu0 %v1528_v20 }
  0x97   :  { %628 = vmatpush1.bf16.msra.mxu0 %v1539_v23 }
  0x98   :  { %779 = vmatprep.subr.bf16.mxu0 %v1481_v10 }
  0xea   :  { %v418_v36 = vpop.f32.mrb[0].mxu1 }
  0xeb   :  { %v420_v37 = vpop.f32.mrb[1].mxu1 }
  0xec   :  { %v422_v38 = vpop.f32.mrb[2].mxu1 }
  0xed   :  { %v423_v39 = vpop.f32.mrb[3].mxu1 }
 0x15d   :  { %v275_v46 = vpop.f32.mrb[0].mxu0 }
 0x15e   :  { %v276_v47 = vadd.f32 %v275_v46, %v1590_v44  ;;  %v277_v48 = vpop.f32.mrb[1].mxu0 }
 0x15f   :  { %v278_v49 = vadd.f32 %v277_v48, %v1592_v45  ;;  %v279_v50 = vpop.f32.mrb[2].mxu0 }
 0x160   :  { %v425_v51 = vadd.f32 %v418_v36, %v276_v47  ;;  %v281_v52 = vpop.f32.mrb[3].mxu0  ;;  %v280_v9 = vadd.f32 %v279_v50, %v1590_v44  ;;  %v36_v36 = vld [vmem:[%s1811_s0 + $0x18] sm:$0xff] }
 0x161   :  { %v426_v53 = vadd.f32 %v420_v37, %v278_v49  ;;  %v282_v11 = vadd.f32 %v281_v52, %v1592_v45  ;;  %v76_v37 = vld [vmem:[%s1812_s1 + $0x18] sm:$0xff] }
 0x162   :  { %v1156_v55 = vmul.f32 -1.442695, %v425_v51 }
 0x163   :  { %1251 = vtanh.f32 %v426_v53  ;;  %v1157_v1 = vmul.f32 -1.442695, %v426_v53 }
 0x164   :  { %1253 = vpow2.f32 %v1156_v55 }
 0x16d   :  { %v1252_v54 = vpop.eup %1251 }
 0x16e   :  { %442 = vrot.lane.b32.xlu0 %v1252_v54, %s1397_s17  ;;  %v1254_v56 = vpop.eup %1253 }
 0x16f   :  { %v433_v57 = vadd.f32 1.0, %v1254_v56 }
 0x171   :  { %1255 = vrcp.f32 %v433_v57 }
 0x17b   :  { %v1256_v58 = vpop.eup %1255 }
 0x17c   :  { %v440_v61 = vmul.f32 0.0, %v1256_v58 }
 0x1e0   :  { %v443_v59 = vpop.permute.xlu0 %442 }
 0x1e1   :  { %v445_v60 = vmul.f32 %v1256_v58, %v443_v59 }
 0x1e3   :  { %447 = vrot.lane.b32.xlu1 %v445_v60, %s1397_s17 }
 0x255   :  { %v448_v62 = vpop.permute.xlu1 %447 }
 0x256   :  { %v450_v63 = vadd.f32 %v448_v62, %v440_v61 }
 0x258   :  { %1257 = vtanh.f32 %v450_v63 }
 0x259   :  { %1259 = vpow2.f32 %v1157_v1 }
 0x262   :  { %v1258_v0 = vpop.eup %1257 }
 0x263   :  { %453 = vrot.lane.b32.xlu0 %v1258_v0, %s1397_s17  ;;  %v1260_v3 = vpop.eup %1259 }
 0x264   :  { %v434_v4 = vadd.f32 1.0, %v1260_v3 }
 0x266   :  { %1261 = vrcp.f32 %v434_v4 }
 0x270   :  { %v1262_v5 = vpop.eup %1261 }
 0x2d5   :  { %v454_v6 = vpop.permute.xlu0 %453 }
 0x2d6   :  { %v456_v7 = vmul.f32 %v1262_v5, %v454_v6  ;;  %v37_v5 = vld [vmem:[%s1811_s0 + $0x20] sm:$0xff] }
 0x2d7   :  { %v77_v6 = vld [vmem:[%s1812_s1 + $0x20] sm:$0xff] }
 0x2d8   :  { %v459_v8 = vpack.c.bf16 %v456_v7, %v456_v7  ;;  %v39_v7 = vld [vmem:[%s1811_s0 + $0x30] sm:$0xff] }
 0x2da   :  { %1158 = vmatmul.mubr.msk.bf16.vlgmr.msra.gmra.mrb[4].mxu1 %vm380_vm7, %v459_v8  ;;  %v79_v8 = vld [vmem:[%s1812_s1 + $0x30] sm:$0xff] }
 0x2db   :  { %543 = vmatpush1.bf16.msra.mxu1 %v1489_v12  ;;  %574 = vmatprep.mubr.bf16.mxu1 %v1395_v2 }
 0x2dc   :  { %544 = vmatprep.subr.bf16.mxu1 %v1499_v14 }
 0x2df   :  { %545 = vmatpush1.bf16.msra.mxu1 %v1504_v15 }
 0x2e0   :  { %546 = vmatprep.subr.bf16.mxu1 %v1510_v16 }
 0x2e3   :  { %547 = vmatpush1.bf16.msra.mxu1 %v1522_v19 }
 0x2e4   :  { %548 = vmatprep.subr.bf16.mxu1 %v1528_v20 }
 0x2e7   :  { %549 = vmatpush1.bf16.msra.mxu1 %v1539_v23 }
 0x2e8   :  { %700 = vmatprep.subr.bf16.mxu1 %v1481_v10 }
 0x3ad   :  { %v497_v13 = vpop.f32.mrb[4].mxu1 }
 0x3ae   :  { %v504_v17 = vadd.f32 %v497_v13, %v280_v9  ;;  %v499_v18 = vpop.f32.mrb[5].mxu1 }
 0x3af   :  { %v505_v21 = vadd.f32 %v499_v18, %v282_v11  ;;  %v501_v22 = vpop.f32.mrb[6].mxu1 }
 0x3b0   :  { %v502_v24 = vpop.f32.mrb[7].mxu1  ;;  %v1159_v28 = vmul.f32 -1.442695, %v504_v17  ;;  %v38_v22 = vld [vmem:[%s1811_s0 + $0x28] sm:$0xff] }
 0x3b1   :  { %1263 = vtanh.f32 %v505_v21  ;;  %v1160_v48 = vmul.f32 -1.442695, %v505_v21  ;;  %v78_v24 = vld [vmem:[%s1812_s1 + $0x28] sm:$0xff] }
 0x3b2   :  { %1265 = vpow2.f32 %v1159_v28 }
 0x3bb   :  { %v1264_v25 = vpop.eup %1263 }
 0x3bc   :  { %521 = vrot.lane.b32.xlu1 %v1264_v25, %s1397_s17  ;;  %v1266_v29 = vpop.eup %1265  ;;  %v40_v25 = vld [vmem:[%s1811_s0 + $0x38] sm:$0xff] }
 0x3bd   :  { %v512_v31 = vadd.f32 1.0, %v1266_v29 }
 0x3bf   :  { %1267 = vrcp.f32 %v512_v31 }
 0x3c0   :  { %48 = vperm.xlu1 %1210, %v35_v26   ;;  %v80_v26 = vld [vmem:[%s1812_s1 + $0x38] sm:$0xff] }
 0x3c4   :  { %88 = vperm.xlu1 %1210, %v75_v27  }
 0x3c9   :  { %v1268_v32 = vpop.eup %1267 }
 0x3ca   :  { %v519_v38 = vmul.f32 %v1268_v32, %v450_v63 }
 0x42e   :  { %v522_v33 = vpop.permute.xlu1 %521 }
 0x42f   :  { %v524_v34 = vmul.f32 %v1268_v32, %v522_v33 }
 0x431   :  { %526 = vrot.lane.b32.xlu0 %v524_v34, %s1397_s17 }
 0x435   :  { %51 = vperm.xlu0 %1209, %v36_v36  }
 0x439   :  { %91 = vperm.xlu0 %1209, %v76_v37  }
 0x43f   :  { %v49_v41 = vpop.permute.xlu1 %48 }
 0x440   :  { %vm67_vm9 = vcmp.eq.s32.totalorder %v1571_v30, %v49_v41 }
 0x443   :  { %v89_v43 = vpop.permute.xlu1 %88 }
 0x444   :  { %vm107_vm8 = vcmp.eq.s32.totalorder %v1571_v30, %v89_v43 }
 0x445   :  { %vm115_vm10 = vmor %vm67_vm9, %vm107_vm8 }
 0x4a3   :  { %v527_v39 = vpop.permute.xlu0 %526 }
 0x4a4   :  { %v1625_v40 = vadd.f32 %v527_v39, %v519_v38 }
 0x4a6   :  { %1269 = vtanh.f32 %v1625_v40 }
 0x4a7   :  { %1271 = vpow2.f32 %v1160_v48 }
 0x4b0   :  { %v1270_v42 = vpop.eup %1269 }
 0x4b1   :  { %532 = vrot.lane.b32.xlu1 %v1270_v42, %s1397_s17  ;;  %v1272_v49 = vpop.eup %1271 }
 0x4b2   :  { %v513_v50 = vadd.f32 1.0, %v1272_v49 }
 0x4b4   :  { %v52_v46 = vpop.permute.xlu0 %51  ;;  %1273 = vrcp.f32 %v513_v50 }
 0x4b5   :  { %vm68_vm11 = vcmp.eq.s32.totalorder %v1571_v30, %v52_v46 }
 0x4b8   :  { %v92_v47 = vpop.permute.xlu0 %91 }
 0x4b9   :  { %vm108_vm12 = vcmp.eq.s32.totalorder %v1571_v30, %v92_v47 }
 0x4ba   :  { %vm116_vm13 = vmor %vm68_vm11, %vm108_vm12 }
 0x4bb   :  { %vm1142_vm14 = vmpackc.low %vm116_vm13, %vm115_vm10 }
 0x4bc   :  { %1143 = vmatmul.mubr.msk.bf16.gmra.mrb[4].mxu0 %vm1142_vm14, %v1396_v35  ;;  %vm1399_vm14 = vmmov 0  }
 0x4bd   :  { %293 = vmatprep.mubr.bf16.mxu0 %v1395_v2 }
 0x4be   :  { %v1274_v51 = vpop.eup %1273 }
 0x523   :  { %v533_v52 = vpop.permute.xlu1 %532 }
 0x524   :  { %v535_v53 = vmul.f32 %v1274_v51, %v533_v52 }
 0x526   :  { %v538_v54 = vpack.c.bf16 %v535_v53, %v535_v53 }
 0x528   :  { %1161 = vmatmul.mubr.msk.bf16.vlgmr.msra.gmra.mrb[8].mxu1 %vm380_vm7, %v538_v54 }
 0x529   :  { %701 = vmatpush1.bf16.msra.mxu1 %v1489_v12  ;;  %732 = vmatprep.mubr.bf16.mxu1 %v1395_v2 }
 0x52a   :  { %702 = vmatprep.subr.bf16.mxu1 %v1499_v14 }
 0x52d   :  { %703 = vmatpush1.bf16.msra.mxu1 %v1504_v15 }
 0x52e   :  { %704 = vmatprep.subr.bf16.mxu1 %v1510_v16 }
 0x531   :  { %705 = vmatpush1.bf16.msra.mxu1 %v1522_v19 }
 0x532   :  { %706 = vmatprep.subr.bf16.mxu1 %v1528_v20 }
 0x535   :  { %707 = vmatpush1.bf16.msra.mxu1 %v1539_v23 }
 0x536   :  { %858 = vmatprep.subr.bf16.mxu1 %v1481_v10 }
 0x58f   :  { %v285_v55 = vpop.f32.mrb[4].mxu0 }
 0x590   :  { %v287_v56 = vpop.f32.mrb[5].mxu0  ;;  %v286_v59 = vadd.f32 %v285_v55, %v1590_v44 }
 0x591   :  { %v1645_v57 = vpop.f32.mrb[6].mxu0  ;;  %v288_v60 = vadd.f32 %v287_v56, %v1592_v45 }
 0x592   :  { %v1647_v58 = vpop.f32.mrb[7].mxu0  ;;  %v290_v56 = vadd.f32 %v1645_v57, %v1590_v44 }
 0x5fb   :  { %v576_v61 = vpop.f32.mrb[8].mxu1 }
 0x5fc   :  { %v583_v62 = vadd.f32 %v576_v61, %v286_v59  ;;  %v578_v63 = vpop.f32.mrb[9].mxu1 }
 0x5fd   :  { %v584_v0 = vadd.f32 %v578_v63, %v288_v60  ;;  %v580_v1 = vpop.f32.mrb[10].mxu1 }
 0x5fe   :  { %v581_v3 = vpop.f32.mrb[11].mxu1  ;;  %v1162_v9 = vmul.f32 -1.442695, %v583_v62 }
 0x5ff   :  { %1275 = vtanh.f32 %v584_v0  ;;  %v1163_v41 = vmul.f32 -1.442695, %v584_v0 }
 0x600   :  { %1277 = vpow2.f32 %v1162_v9 }
 0x609   :  { %v1276_v4 = vpop.eup %1275 }
 0x60a   :  { %600 = vrot.lane.b32.xlu0 %v1276_v4, %s1397_s17  ;;  %v1278_v11 = vpop.eup %1277 }
 0x60b   :  { %v591_v13 = vadd.f32 1.0, %v1278_v11 }
 0x60d   :  { %1279 = vrcp.f32 %v591_v13 }
 0x60e   :  { %54 = vperm.xlu0 %1209, %v37_v5  }
 0x612   :  { %94 = vperm.xlu0 %1209, %v77_v6  }
 0x616   :  { %60 = vperm.xlu0 %1209, %v39_v7  }
 0x617   :  { %v1280_v17 = vpop.eup %1279 }
 0x618   :  { %v598_v27 = vmul.f32 %v1280_v17, %v1625_v40 }
 0x61a   :  { %100 = vperm.xlu0 %1209, %v79_v8  }
 0x67c   :  { %v601_v18 = vpop.permute.xlu0 %600 }
 0x67d   :  { %v603_v21 = vmul.f32 %v1280_v17, %v601_v18 }
 0x67f   :  { %605 = vrot.lane.b32.xlu1 %v603_v21, %s1397_s17 }
 0x683   :  { %57 = vperm.xlu1 %1210, %v38_v22  }
 0x687   :  { %97 = vperm.xlu1 %1210, %v78_v24  }
 0x68b   :  { %63 = vperm.xlu1 %1210, %v40_v25  }
 0x68d   :  { %v55_v31 = vpop.permute.xlu0 %54 }
 0x68e   :  { %vm69_vm0 = vcmp.eq.s32.totalorder %v1571_v30, %v55_v31 }
 0x68f   :  { %103 = vperm.xlu1 %1210, %v80_v26  }
 0x691   :  { %v95_v32 = vpop.permute.xlu0 %94 }
 0x692   :  { %vm109_vm15 = vcmp.eq.s32.totalorder %v1571_v30, %v95_v32 }
 0x693   :  { %vm117_vm1 = vmor %vm69_vm0, %vm109_vm15 }
 0x695   :  { %v61_v36 = vpop.permute.xlu0 %60 }
 0x696   :  { %vm71_vm8 = vcmp.eq.s32.totalorder %v1571_v30, %v61_v36 }
 0x699   :  { %v101_v38 = vpop.permute.xlu0 %100 }
 0x69a   :  { %vm111_vm6 = vcmp.eq.s32.totalorder %v1571_v30, %v101_v38 }
 0x69b   :  { %vm119_vm9 = vmor %vm71_vm8, %vm111_vm6 }
 0x6f1   :  { %v606_v28 = vpop.permute.xlu1 %605 }
 0x6f2   :  { %v1678_v29 = vadd.f32 %v606_v28, %v598_v27 }
 0x6f4   :  { %1281 = vtanh.f32 %v1678_v29 }
 0x6f5   :  { %1283 = vpow2.f32 %v1163_v41 }
 0x6fe   :  { %v1282_v33 = vpop.eup %1281 }
 0x6ff   :  { %611 = vrot.lane.b32.xlu0 %v1282_v33, %s1397_s17  ;;  %v1284_v42 = vpop.eup %1283 }
 0x700   :  { %v592_v43 = vadd.f32 1.0, %v1284_v42 }
 0x702   :  { %v58_v34 = vpop.permute.xlu1 %57  ;;  %1285 = vrcp.f32 %v592_v43 }
 0x703   :  { %vm70_vm2 = vcmp.eq.s32.totalorder %v1571_v30, %v58_v34 }
 0x706   :  { %v98_v37 = vpop.permute.xlu1 %97 }
 0x707   :  { %vm110_vm3 = vcmp.eq.s32.totalorder %v1571_v30, %v98_v37 }
 0x708   :  { %vm118_vm4 = vmor %vm70_vm2, %vm110_vm3 }
 0x709   :  { %vm1144_vm5 = vmpackc.low %vm118_vm4, %vm117_vm1 }
 0x70a   :  { %v64_v39 = vpop.permute.xlu1 %63  ;;  %1145 = vmatmul.mubr.msk.bf16.gmra.mrb[8].mxu0 %vm1144_vm5, %v1396_v35 }
 0x70b   :  { %303 = vmatprep.mubr.bf16.mxu0 %v1395_v2  ;;  %vm72_vm10 = vcmp.eq.s32.totalorder %v1571_v30, %v64_v39 }
 0x70c   :  { %v1286_v46 = vpop.eup %1285 }
 0x70e   :  { %v104_v40 = vpop.permute.xlu1 %103 }
 0x70f   :  { %vm112_vm11 = vcmp.eq.s32.totalorder %v1571_v30, %v104_v40 }
 0x710   :  { %vm120_vm12 = vmor %vm72_vm10, %vm112_vm11 }
 0x711   :  { %vm1146_vm13 = vmpackc.low %vm120_vm12, %vm119_vm9 }
 0x712   :  { %1147 = vmatmul.mubr.msk.bf16.gmra.mrb[12].mxu0 %vm1146_vm13, %v1396_v35 }
 0x713   :  { %653 = vmatprep.mubr.bf16.mxu0 %v1395_v2 }
 0x771   :  { %v612_v47 = vpop.permute.xlu0 %611 }
 0x772   :  { %v614_v48 = vmul.f32 %v1286_v46, %v612_v47 }
 0x774   :  { %v617_v49 = vpack.c.bf16 %v614_v48, %v614_v48 }
 0x776   :  { %1164 = vmatmul.mubr.msk.bf16.vlgmr.msra.gmra.mrb[16].mxu0 %vm380_vm7, %v617_v49 }
 0x777   :  { %780 = vmatpush1.bf16.msra.mxu0 %v1489_v12  ;;  %811 = vmatprep.mubr.bf16.mxu0 %v1395_v2 }
 0x778   :  { %781 = vmatprep.subr.bf16.mxu0 %v1499_v14 }
 0x77b   :  { %782 = vmatpush1.bf16.msra.mxu0 %v1504_v15 }
 0x77c   :  { %783 = vmatprep.subr.bf16.mxu0 %v1510_v16 }
 0x77f   :  { %784 = vmatpush1.bf16.msra.mxu0 %v1522_v19 }
 0x780   :  { %785 = vmatprep.subr.bf16.mxu0 %v1528_v20 }
 0x783   :  { %786 = vmatpush1.bf16.msra.mxu0 %v1539_v23 }
 0x784   :  { %937 = vmatprep.subr.bf16.mxu0 %v1481_v10  ;;  %v292_v10 = vadd.f32 %v1647_v58, %v1592_v45 }
 0x7dd   :  { %v295_v30 = vpop.f32.mrb[8].mxu0 }
 0x7de   :  { %v297_v35 = vpop.f32.mrb[9].mxu0  ;;  %v296_v26 = vadd.f32 %v295_v30, %v1590_v44 }
 0x7df   :  { %v1704_v50 = vpop.f32.mrb[10].mxu0  ;;  %v298_v27 = vadd.f32 %v297_v35, %v1592_v45 }
 0x7e0   :  { %v1706_v51 = vpop.f32.mrb[11].mxu0 }
 0x7e5   :  { %v1708_v52 = vpop.f32.mrb[12].mxu0 }
 0x7e6   :  { %v1710_v53 = vpop.f32.mrb[13].mxu0 }
 0x7e7   :  { %v1712_v54 = vpop.f32.mrb[14].mxu0 }
 0x7e8   :  { %v1714_v55 = vpop.f32.mrb[15].mxu0 }
 0x849   :  { %v655_v59 = vpop.f32.mrb[16].mxu0 }
 0x84a   :  { %v662_v60 = vadd.f32 %v655_v59, %v290_v56  ;;  %v657_v61 = vpop.f32.mrb[17].mxu0 }
 0x84b   :  { %v663_v62 = vadd.f32 %v657_v61, %v292_v10  ;;  %v659_v63 = vpop.f32.mrb[18].mxu0  ;;  %v300_v61 = vadd.f32 %v1704_v50, %v1590_v44 }
 0x84c   :  { %v660_v0 = vpop.f32.mrb[19].mxu0  ;;  %v1165_v3 = vmul.f32 -1.442695, %v662_v60 }
 0x84d   :  { %1287 = vtanh.f32 %v663_v62  ;;  %v1166_v13 = vmul.f32 -1.442695, %v663_v62 }
 0x84e   :  { %1289 = vpow2.f32 %v1165_v3 }
 0x857   :  { %v1288_v1 = vpop.eup %1287 }
 0x858   :  { %679 = vrot.lane.b32.xlu1 %v1288_v1, %s1397_s17  ;;  %v1290_v4 = vpop.eup %1289 }
 0x859   :  { %v670_v5 = vadd.f32 1.0, %v1290_v4 }
 0x85b   :  { %1291 = vrcp.f32 %v670_v5 }
 0x865   :  { %v1292_v6 = vpop.eup %1291 }
 0x866   :  { %v677_v58 = vmul.f32 %v1292_v6, %v1678_v29 }
 0x8ca   :  { %v680_v57 = vpop.permute.xlu1 %679 }
 0x8cb   :  { %v682_v7 = vmul.f32 %v1292_v6, %v680_v57 }
 0x8cd   :  { %684 = vrot.lane.b32.xlu0 %v682_v7, %s1397_s17 }
 0x93f   :  { %v685_v8 = vpop.permute.xlu0 %684 }
 0x940   :  { %v687_v9 = vadd.f32 %v685_v8, %v677_v58 }
 0x942   :  { %1293 = vtanh.f32 %v687_v9 }
 0x943   :  { %1295 = vpow2.f32 %v1166_v13 }
 0x94c   :  { %v1294_v11 = vpop.eup %1293 }
 0x94d   :  { %690 = vrot.lane.b32.xlu1 %v1294_v11, %s1397_s17  ;;  %v1296_v17 = vpop.eup %1295 }
 0x94e   :  { %v671_v18 = vadd.f32 1.0, %v1296_v17  ;;  %v306_v17 = vadd.f32 %v1708_v52, %v1590_v44 }
 0x950   :  { %1297 = vrcp.f32 %v671_v18  ;;  %v308_v18 = vadd.f32 %v1710_v53, %v1592_v45 }
 0x95a   :  { %v1298_v21 = vpop.eup %1297 }
 0x9bf   :  { %v691_v22 = vpop.permute.xlu1 %690 }
 0x9c0   :  { %v693_v24 = vmul.f32 %v1298_v21, %v691_v22 }
 0x9c2   :  { %v696_v25 = vpack.c.bf16 %v693_v24, %v693_v24 }
 0x9c4   :  { %1167 = vmatmul.mubr.msk.bf16.vlgmr.msra.gmra.mrb[12].mxu1 %vm380_vm7, %v696_v25 }
 0x9c5   :  { %859 = vmatpush1.bf16.msra.mxu1 %v1489_v12  ;;  %890 = vmatprep.mubr.bf16.mxu1 %v1395_v2 }
 0x9c6   :  { %860 = vmatprep.subr.bf16.mxu1 %v1499_v14 }
 0x9c9   :  { %861 = vmatpush1.bf16.msra.mxu1 %v1504_v15 }
 0x9ca   :  { %862 = vmatprep.subr.bf16.mxu1 %v1510_v16 }
 0x9cd   :  { %863 = vmatpush1.bf16.msra.mxu1 %v1522_v19 }
 0x9ce   :  { %864 = vmatprep.subr.bf16.mxu1 %v1528_v20 }
 0x9d1   :  { %865 = vmatpush1.bf16.msra.mxu1 %v1539_v23 }
 0xa97   :  { %v734_v28 = vpop.f32.mrb[12].mxu1 }
 0xa98   :  { %v741_v29 = vadd.f32 %v734_v28, %v296_v26  ;;  %v736_v31 = vpop.f32.mrb[13].mxu1 }
 0xa99   :  { %v742_v32 = vadd.f32 %v736_v31, %v298_v27  ;;  %v738_v33 = vpop.f32.mrb[14].mxu1 }
 0xa9a   :  { %v739_v34 = vpop.f32.mrb[15].mxu1  ;;  %v1168_v37 = vmul.f32 -1.442695, %v741_v29 }
 0xa9b   :  { %1299 = vtanh.f32 %v742_v32  ;;  %v1169_v49 = vmul.f32 -1.442695, %v742_v32 }
 0xa9c   :  { %1301 = vpow2.f32 %v1168_v37 }
 0xaa5   :  { %v1300_v36 = vpop.eup %1299 }
 0xaa6   :  { %758 = vrot.lane.b32.xlu0 %v1300_v36, %s1397_s17  ;;  %v1302_v38 = vpop.eup %1301 }
 0xaa7   :  { %v749_v39 = vadd.f32 1.0, %v1302_v38 }
 0xaa9   :  { %1303 = vrcp.f32 %v749_v39 }
 0xab3   :  { %v1304_v40 = vpop.eup %1303 }
 0xab4   :  { %v756_v43 = vmul.f32 %v1304_v40, %v687_v9 }
 0xb18   :  { %v759_v41 = vpop.permute.xlu0 %758 }
 0xb19   :  { %v761_v42 = vmul.f32 %v1304_v40, %v759_v41 }
 0xb1b   :  { %763 = vrot.lane.b32.xlu1 %v761_v42, %s1397_s17 }
 0xb8d   :  { %v764_v46 = vpop.permute.xlu1 %763 }
 0xb8e   :  { %v766_v47 = vadd.f32 %v764_v46, %v756_v43 }
 0xb90   :  { %1305 = vtanh.f32 %v766_v47 }
 0xb91   :  { %1307 = vpow2.f32 %v1169_v49  ;;  %v312_v49 = vadd.f32 %v1714_v55, %v1592_v45  ;;  %v1398_v55 = vmov 0.0  }
 0xb92   :  { %1190 = vmatprep.subr.bf16.mxu1 %v1398_v55 }
 0xb9a   :  { %v1306_v48 = vpop.eup %1305 }
 0xb9b   :  { %769 = vrot.lane.b32.xlu0 %v1306_v48, %s1397_s17  ;;  %v1308_v30 = vpop.eup %1307  ;;  %v310_v48 = vadd.f32 %v1712_v54, %v1590_v44 }
 0xb9c   :  { %v750_v35 = vadd.f32 1.0, %v1308_v30 }
 0xb9e   :  { %1309 = vrcp.f32 %v750_v35 }
 0xba8   :  { %v1310_v56 = vpop.eup %1309 }
 0xc0d   :  { %v770_v10 = vpop.permute.xlu0 %769 }
 0xc0e   :  { %v772_v59 = vmul.f32 %v1310_v56, %v770_v10 }
 0xc10   :  { %v775_v60 = vpack.c.bf16 %v772_v59, %v772_v59 }
 0xc12   :  { %1170 = vmatmul.mubr.msk.bf16.vlgmr.msra.gmra.mrb[20].mxu0 %vm380_vm7, %v775_v60 }
 0xc13   :  { %938 = vmatpush1.bf16.msra.mxu0 %v1489_v12  ;;  %969 = vmatprep.mubr.bf16.mxu0 %v1395_v2  ;;  %v302_v12 = vadd.f32 %v1706_v51, %v1592_v45  ;;  %v1247_v45 = vld [vmem:[%s1816_s5] sm:$0xff]  }
 0xc14   :  { %939 = vmatprep.subr.bf16.mxu0 %v1499_v14 }
 0xc17   :  { %940 = vmatpush1.bf16.msra.mxu0 %v1504_v15 }
 0xc18   :  { %941 = vmatprep.subr.bf16.mxu0 %v1510_v16 }
 0xc1b   :  { %942 = vmatpush1.bf16.msra.mxu0 %v1522_v19 }
 0xc1c   :  { %943 = vmatprep.subr.bf16.mxu0 %v1528_v20 }
 0xc1f   :  { %944 = vmatpush1.bf16.msra.mxu0 %v1539_v23 }
 0xce5   :  { %v813_v62 = vpop.f32.mrb[20].mxu0 }
 0xce6   :  { %v820_v2 = vadd.f32 %v813_v62, %v300_v61  ;;  %v815_v63 = vpop.f32.mrb[21].mxu0 }
 0xce7   :  { %v821_v14 = vadd.f32 %v815_v63, %v302_v12  ;;  %v817_v0 = vpop.f32.mrb[22].mxu0 }
 0xce8   :  { %v818_v15 = vpop.f32.mrb[23].mxu0  ;;  %v1171_v19 = vmul.f32 -1.442695, %v820_v2  ;;  %v1249_v0 = vld [vmem:[%s1816_s5 + $0x10] sm:$0xff]  }
 0xce9   :  { %1311 = vtanh.f32 %v821_v14  ;;  %v1172_v57 = vmul.f32 -1.442695, %v821_v14  ;;  %v1248_v14 = vld [vmem:[%s1816_s5 + $0x8] sm:$0xff]  }
 0xcea   :  { %1313 = vpow2.f32 %v1171_v19  ;;  %v1250_v19 = vld [vmem:[%s1816_s5 + $0x18] sm:$0xff]   ;;  %s1400_s5 = smov [#allocation5]  }
 0xceb   :  { %s1112_s23 = sshll.u32 %s1400_s5, 4  ;;  %s1113_s23 = int_to_ptr.vmem [resolvable:$true] %s1112_s23 }
 0xcec   :  { %s1347_s24 = scalar_lea.vmem %s1113_s23, 128  ;;  %p1352_p1 = scmp.lt.s32.totalorder %s1113_s23, %s1113_s23 }
 0xced   :  { %p1348_p0 = scmp.ne.s32.totalorder %s1113_s23, %s1347_s24  ;;  %p1353_p2 = scmp.lt.s32.totalorder %s1347_s24, %s1347_s24 }
 0xcef   :  { %p1354_p3 = por %p1353_p2, %p1352_p1 }
 0xcf1   :  { %p1355_p4 = pnand %p1354_p3, %p1348_p0 }
 0xcf3   :  { %v1312_v16 = vpop.eup %1311 }
 0xcf4   :  { %837 = vrot.lane.b32.xlu1 %v1312_v16, %s1397_s17  ;;  %v1314_v20 = vpop.eup %1313 }
 0xcf5   :  { %v828_v23 = vadd.f32 1.0, %v1314_v20 }
 0xcf7   :  { %1315 = vrcp.f32 %v828_v23 }
 0xd01   :  { %v1316_v1 = vpop.eup %1315 }
 0xd02   :  { %v835_v51 = vmul.f32 %v1316_v1, %v766_v47 }
 0xd66   :  { %v838_v50 = vpop.permute.xlu1 %837 }
 0xd67   :  { %v840_v3 = vmul.f32 %v1316_v1, %v838_v50 }
 0xd69   :  { %842 = vrot.lane.b32.xlu0 %v840_v3, %s1397_s17 }
 0xddb   :  { %v843_v4 = vpop.permute.xlu0 %842 }
 0xddc   :  { %v845_v5 = vadd.f32 %v843_v4, %v835_v51 }
 0xdde   :  { %1317 = vtanh.f32 %v845_v5 }
 0xddf   :  { %1319 = vpow2.f32 %v1172_v57 }
 0xde8   :  { %v1318_v6 = vpop.eup %1317 }
 0xde9   :  { %848 = vrot.lane.b32.xlu1 %v1318_v6, %s1397_s17  ;;  %v1320_v7 = vpop.eup %1319 }
 0xdea   :  { %v829_v58 = vadd.f32 1.0, %v1320_v7 }
 0xdec   :  { %1321 = vrcp.f32 %v829_v58 }
 0xdf6   :  { %v1322_v8 = vpop.eup %1321 }
 0xe5b   :  { %v849_v9 = vpop.permute.xlu1 %848 }
 0xe5c   :  { %v851_v11 = vmul.f32 %v1322_v8, %v849_v9 }
 0xe5e   :  { %v854_v13 = vpack.c.bf16 %v851_v11, %v851_v11 }
 0xe60   :  { %1173 = vmatmul.mubr.msk.bf16.vlgmr.msra.gmra.mrb[16].mxu1 %vm380_vm7, %v854_v13 }
 0xe61   :  { %1191 = vmatpush3.bf16.msra.mxu1 %v1247_v45  ;;  %1198 = vmatprep.mubr.msk.bf16.mxu1 %vm1399_vm14, %v1398_v55 }
 0xe62   :  { %1192 = vmatprep.subr.bf16.mxu1 %v1398_v55 }
 0xe65   :  { %1193 = vmatpush3.bf16.msra.mxu1 %v1248_v14 }
 0xe66   :  { %1194 = vmatprep.subr.bf16.mxu1 %v1398_v55 }
 0xe69   :  { %1195 = vmatpush3.bf16.msra.mxu1 %v1249_v0 }
 0xe6a   :  { %1196 = vmatprep.subr.bf16.mxu1 %v1398_v55 }
 0xe6d   :  { %1197 = vmatpush3.bf16.msra.mxu1 %v1250_v19 }
 0xf33   :  { %v892_v21 = vpop.f32.mrb[16].mxu1 }
 0xf34   :  { %v899_v22 = vadd.f32 %v892_v21, %v306_v17  ;;  %v894_v24 = vpop.f32.mrb[17].mxu1 }
 0xf35   :  { %v900_v25 = vadd.f32 %v894_v24, %v308_v18  ;;  %v896_v26 = vpop.f32.mrb[18].mxu1 }
 0xf36   :  { %v897_v27 = vpop.f32.mrb[19].mxu1  ;;  %v1174_v29 = vmul.f32 -1.442695, %v899_v22 }
 0xf37   :  { %1323 = vtanh.f32 %v900_v25  ;;  %v1175_v39 = vmul.f32 -1.442695, %v900_v25 }
 0xf38   :  { %1325 = vpow2.f32 %v1174_v29 }
 0xf41   :  { %v1324_v28 = vpop.eup %1323 }
 0xf42   :  { %916 = vrot.lane.b32.xlu0 %v1324_v28, %s1397_s17  ;;  %v1326_v31 = vpop.eup %1325 }
 0xf43   :  { %v907_v32 = vadd.f32 1.0, %v1326_v31 }
 0xf45   :  { %1327 = vrcp.f32 %v907_v32 }
 0xf4f   :  { %v1328_v33 = vpop.eup %1327 }
 0xf50   :  { %v914_v53 = vmul.f32 %v1328_v33, %v845_v5 }
 0xfb4   :  { %v917_v52 = vpop.permute.xlu0 %916 }
 0xfb5   :  { %v919_v34 = vmul.f32 %v1328_v33, %v917_v52 }
 0xfb7   :  { %921 = vrot.lane.b32.xlu1 %v919_v34, %s1397_s17 }
0x1029   :  { %v922_v36 = vpop.permute.xlu1 %921 }
0x102a   :  { %v924_v37 = vadd.f32 %v922_v36, %v914_v53 }
0x102c   :  { %1329 = vtanh.f32 %v924_v37 }
0x102d   :  { %1331 = vpow2.f32 %v1175_v39 }
0x1036   :  { %v1330_v38 = vpop.eup %1329 }
0x1037   :  { %927 = vrot.lane.b32.xlu0 %v1330_v38, %s1397_s17  ;;  %v1332_v40 = vpop.eup %1331 }
0x1038   :  { %v908_v41 = vadd.f32 1.0, %v1332_v40 }
0x103a   :  { %1333 = vrcp.f32 %v908_v41 }
0x1044   :  { %v1334_v42 = vpop.eup %1333 }
0x10a9   :  { %v928_v43 = vpop.permute.xlu0 %927 }
0x10aa   :  { %v930_v46 = vmul.f32 %v1334_v42, %v928_v43 }
0x10ac   :  { %v933_v47 = vpack.c.bf16 %v930_v46, %v930_v46 }
0x10ae   :  { %1176 = vmatmul.mubr.msk.bf16.vlgmr.msra.gmra.mrb[24].mxu0 %vm380_vm7, %v933_v47 }
0x1181   :  { %v971_v30 = vpop.f32.mrb[24].mxu0 }
0x1182   :  { %v978_v35 = vadd.f32 %v971_v30, %v310_v48  ;;  %v973_v56 = vpop.f32.mrb[25].mxu0 }
0x1183   :  { %v979_v10 = vadd.f32 %v973_v56, %v312_v49  ;;  %v975_v59 = vpop.f32.mrb[26].mxu0 }
0x1184   :  { %v976_v60 = vpop.f32.mrb[27].mxu0  ;;  %v1177_v12 = vmul.f32 -1.442695, %v978_v35 }
0x1185   :  { %1335 = vtanh.f32 %v979_v10  ;;  %v1178_v1 = vmul.f32 -1.442695, %v979_v10 }
0x1186   :  { %1337 = vpow2.f32 %v1177_v12 }
0x118f   :  { %v1336_v61 = vpop.eup %1335 }
0x1190   :  { %995 = vrot.lane.b32.xlu1 %v1336_v61, %s1397_s17  ;;  %v1338_v62 = vpop.eup %1337 }
0x1191   :  { %v986_v2 = vadd.f32 1.0, %v1338_v62 }
0x1193   :  { %1339 = vrcp.f32 %v986_v2 }
0x119d   :  { %v1340_v63 = vpop.eup %1339 }
0x119e   :  { %v993_v15 = vmul.f32 %v1340_v63, %v924_v37 }
0x1202   :  { %v996_v44 = vpop.permute.xlu1 %995 }
0x1203   :  { %v998_v54 = vmul.f32 %v1340_v63, %v996_v44 }
0x1205   :  { %1000 = vrot.lane.b32.xlu0 %v998_v54, %s1397_s17 }
0x1277   :  { %v1001_v16 = vpop.permute.xlu0 %1000 }
0x1278   :  { %v1003_v20 = vadd.f32 %v1001_v16, %v993_v15 }
0x127a   :  { %1341 = vtanh.f32 %v1003_v20 }
0x127b   :  { %1343 = vpow2.f32 %v1178_v1 }
0x1284   :  { %v1342_v23 = vpop.eup %1341 }
0x1285   :  { %1006 = vrot.lane.b32.xlu1 %v1342_v23, %s1397_s17  ;;  %v1344_v50 = vpop.eup %1343 }
0x1286   :  { %v987_v3 = vadd.f32 1.0, %v1344_v50 }
0x1288   :  { %1345 = vrcp.f32 %v987_v3 }
0x1292   :  { %v1346_v51 = vpop.eup %1345 }
0x12f7   :  { %v1007_v4 = vpop.permute.xlu1 %1006 }
0x12f8   :  { %v1009_v5 = vmul.f32 %v1346_v51, %v1007_v4 }
0x12fa   :  { %v1010_v6 = vpack.c.bf16 %v1009_v5, %v1009_v5  ;;  %v1094_v57 = vsel %vm380_vm7, %v1009_v5, 0.0 }
0x12fb   :  { %1095 = vst [vmem:[#allocation5] sm:$0xff] %v1094_v57 }
0x12fc   :  { %1199 = vmatmul.mubr.msk.bf16.vlgmr.msra.gmra.mrb[20].mxu1 %vm380_vm7, %v1010_v6 }
0x12fd   :  { %1358 = shalt.err (!%p1355_p4)
}
0x12fe   :  { %s1359_s26 = scalar_lea.hbm %s1819_s8, 128 }
0x12ff   :  { %p1360_p5 = scmp.ne.s32.totalorder %s1819_s8, %s1359_s26  ;;  %p1363_p6 = scmp.lt.u32.totalorder %s1359_s26, %s1819_s8 }
0x1301   :  { %p1365_p7 = pnand %p1363_p6, %p1360_p5 }
0x1303   :  { %1368 = shalt.err (!%p1365_p7)
}
0x1304   :  { %1115 = dma.vmem_to_hbm [thread:$0]  %s1113_s23, 128, %s1819_s8, [#allocation6]   ;;  %v1179_v7 = vld [vmem:[%s1817_s6] ss:$0 sm:$0xff] }
0x1305   :  { %s1401_s12 = smov [#allocation3]  }
0x1306   :  { %s1102_s13 = sshll.u32 %s1401_s12, 4  ;;  %s1103_s13 = int_to_ptr.vmem [resolvable:$true] %s1102_s13 }
0x1307   :  { %s1369_s14 = scalar_lea.vmem %s1103_s13, 128  ;;  %p1374_p9 = scmp.lt.s32.totalorder %s1103_s13, %s1103_s13 }
0x1308   :  { %p1370_p8 = scmp.ne.s32.totalorder %s1103_s13, %s1369_s14  ;;  %p1375_p10 = scmp.lt.s32.totalorder %s1369_s14, %s1369_s14 }
0x130a   :  { %p1376_p11 = por %p1375_p10, %p1374_p9 }
0x130c   :  { %p1377_p12 = pnand %p1376_p11, %p1370_p8 }
0x13cf   :  { %v1087_v58 = vpop.f32.mrb[20].mxu1 }
0x13d0   :  { %v1088_v8 = vadd.f32 %v1179_v7, %v1087_v58  ;;  %v1200_v9 = vpop.f32.mrb[21].mxu1 }
0x13d1   :  { %v1090_v11 = vpop.f32.mrb[22].mxu1 }
0x13d2   :  { %1093 = vst [vmem:[#allocation3] sm:$0xff] %v1088_v8  ;;  %v1201_v13 = vpop.f32.mrb[23].mxu1 }
0x13d3   :  { %1380 = shalt.err (!%p1377_p12)
}
0x13d4   :  { %s1381_s6 = scalar_lea.hbm %s1818_s7, 128 }
0x13d5   :  { %p1382_p13 = scmp.ne.s32.totalorder %s1818_s7, %s1381_s6  ;;  %p1385_p0 = scmp.lt.u32.totalorder %s1381_s6, %s1818_s7 }
0x13d7   :  { %p1387_p1 = pnand %p1385_p0, %p1382_p13 }
0x13d9   :  { %1390 = shalt.err (!%p1387_p1)
}
0x13da   :  { %1105 = dma.vmem_to_hbm [thread:$0]  %s1103_s13, 128, %s1818_s7, [#allocation4]  }
0x13db   :  { %1391 = dma.done.wait [#allocation4], 128  }
0x13dc   :  { %1392 = vsyncadd [#allocation4], 4294967168 }
0x13dd   :  { %1393 = dma.done.wait [#allocation6], 128  }
0x13de   :  { %1394 = vsyncadd [#allocation6], 4294967168 }
0x13df   :  { %1122 = vsyncpa [#allocation4], 1 }
0x13e0   :  { %1123 = vsyncpa [#allocation6], 1 }

</bundles_post_ra>
